<compile_context>
chip_gen: v5e
topology: v5e:2x2
jax: 0.10.0
libtpu: 0.0.40
codegen_flags: <defaults>
</compile_context>

<pallas_src>
import functools

import jax
import jax.numpy as jnp
from jax.experimental import pallas as pl
from jax.experimental.pallas import tpu as pltpu


# ----------------------------------------------------------------------------
# Kernel: two MXU dots per batch element.
# ----------------------------------------------------------------------------
def _hhavwgcn_kernel(s_ref, x_ref, emb_rep_ref, emb_ref, wpa_ref, out_ref, *,
                     cheb_k, node_num, row_start, dim_in, embed_dim,
                     matmul_dtype):
    """Refs (per grid step b):
      s_ref       : ((K-1)*N, Ns)        precomputed Chebyshev middle rows,
                                         row-blocks ordered k=1..K-1 (matmul_dtype)
      x_ref       : (1, Ns, Cin)         x[b]  (f32)
      emb_rep_ref : (N, D*K*Cin)         emb[n,d] repeated K*Cin per d (f32)
      emb_ref     : (N, D)               node embeddings (f32)
      wpa_ref     : (D*K*Cin + D, Cout128) [weights_pool flat (d,k,i); bias_pool],
                                         zero-padded to 128-lane Cout (matmul_dtype)
      out_ref     : (1, N, Cout128)      f32 output (lane-dense store)
    """
    N, K, Cin, D = node_num, cheb_k, dim_in, embed_dim

    x_b = x_ref[0]                                            # (Ns, Cin) f32

    # ---- (1) fused supports matmul, all k >= 1 in one MXU push --------------
    y = jnp.dot(s_ref[...].astype(matmul_dtype),
                x_b.astype(matmul_dtype),
                preferred_element_type=jnp.float32)           # ((K-1)*N, Cin)

    # ---- (2) assemble xg (N, K*Cin) ------------------------------------------
    # k = 0 (identity support) is an exact f32 row-slice of x; k >= 1 are
    # sublane row-slices of y (row_start and N are multiples of 8 here, so the
    # slices stay cheap views).  One lane-concat total.
    cols = [x_b[row_start:row_start + N, :].astype(jnp.float32)]
    cols += [y[(k - 1) * N:k * N, :] for k in range(1, K)]
    xg = jnp.concatenate(cols, axis=1)                        # (N, K*Cin) f32

    # ---- (3) node-adaptive contraction + bias as ONE MXU dot -----------------
    # out[n,o] = sum_{d,k,i} emb[n,d]*xg[n,k,i]*wp[d,k,i,o] + emb[n,:]@bp
    # Column order of z_aug is (d,k,i) then D bias columns; this must match
    # wpa rows = [weights_pool.reshape(D*K*Cin, Cout); bias_pool] (see
    # hhavwgcn_precompute) -- guarded by the reference test in __main__.
    # D*K*Cin is small (<=128) here, so the D-fold lane tiling is acceptable.
    xg_tiled = jnp.concatenate([xg] * D, axis=1)              # (N, D*K*Cin) f32
    z_aug = jnp.concatenate([emb_rep_ref[...] * xg_tiled, emb_ref[...]],
                            axis=1)                           # (N, D*K*Cin+D)
    out = jnp.dot(z_aug.astype(matmul_dtype), wpa_ref[...],
                  preferred_element_type=jnp.float32)         # (N, Cout128)

    out_ref[0] = out.astype(out_ref.dtype)                    # lane-dense store


# ----------------------------------------------------------------------------
# One-time (per graph / per model) precompute -- all in f32 XLA, off the hot path.
# ----------------------------------------------------------------------------
def construct_adj(adj, steps):
    """Local spatio-temporal adjacency (steps*N, steps*N) -- vectorised kron."""
    A = adj.astype(jnp.float32)
    eye_steps = jnp.eye(steps, dtype=jnp.float32)
    off = (jnp.eye(steps, k=1, dtype=jnp.float32)
           + jnp.eye(steps, k=-1, dtype=jnp.float32))
    eye_n = jnp.eye(A.shape[0], dtype=jnp.float32)
    return jnp.kron(eye_steps, A) + jnp.kron(off, eye_n)


def hhavwgcn_precompute(node_embeddings, adj, weights_pool, bias_pool, cheb_k,
                        n_x_nodes, *, matmul_dtype=jnp.bfloat16):
    """Static operands: Chebyshev middle-row stack, emb replication, weight pool.

    Compute ONCE per graph / model and pass via `precomputed=` to keep the
    O(K*Ns^3) recursion and the embedding replication off the per-forward path.
    The Chebyshev recursion is done in f32; only the stored MXU operands are
    cast to `matmul_dtype`.
    """
    node_num = adj.shape[0]
    D, K, Cin, Cout = weights_pool.shape
    assert K == cheb_k and cheb_k >= 2

    if n_x_nodes == node_num:
        A = adj.astype(jnp.float32)
        row_start = 0
    elif n_x_nodes == 3 * node_num:
        A = construct_adj(adj, 3)
        row_start = node_num                  # middle N nodes
    else:
        raise ValueError("x.shape[1] must be node_num or 3*node_num")
    Ns = A.shape[0]

    # s_stack[(k-1)*N + n, m] = T_k[row_start + n, m], k = 1..K-1 (f32 recursion)
    blocks = [A[row_start:row_start + node_num, :]]
    t_km2 = jnp.eye(Ns, dtype=jnp.float32)    # T_0
    t_km1 = A                                 # T_1
    for _ in range(2, cheb_k):
        t_k = 2.0 * (A @ t_km1) - t_km2
        blocks.append(t_k[row_start:row_start + node_num, :])
        t_km2, t_km1 = t_km1, t_k
    s_stack = jnp.concatenate(blocks, axis=0).astype(matmul_dtype)

    emb = node_embeddings.astype(jnp.float32)                 # (N, D)
    emb_rep = jnp.repeat(emb, K * Cin, axis=1)                # (N, D*K*Cin), (d,k,i) cols

    cout_pad = ((Cout + 127) // 128) * 128                    # lane-dense output
    wpa = jnp.concatenate(
        [weights_pool.astype(jnp.float32).reshape(D * K * Cin, Cout),
         bias_pool.astype(jnp.float32)], axis=0)              # (D*K*Cin + D, Cout)
    wpa = jnp.pad(wpa, ((0, 0), (0, cout_pad - Cout))).astype(matmul_dtype)

    return dict(s_stack=s_stack, row_start=row_start, emb=emb, emb_rep=emb_rep,
                wpa=wpa)


# ----------------------------------------------------------------------------
# Forward wrapper.
# ----------------------------------------------------------------------------
def hhavwgcn_forward(x, node_embeddings, adj, weights_pool, bias_pool, cheb_k,
                     *, matmul_dtype=jnp.bfloat16, precomputed=None):
    """Pallas implementation of HHAVWGCN.forward.  Output dtype f32."""
    node_num = adj.shape[0]
    B, n_x, Cin = x.shape
    D, K, Cin_w, Cout = weights_pool.shape
    assert K == cheb_k and cheb_k >= 2 and Cin_w == Cin
    assert node_embeddings.shape == (node_num, D)

    if precomputed is None:
        precomputed = hhavwgcn_precompute(node_embeddings, adj, weights_pool,
                                          bias_pool, cheb_k, n_x,
                                          matmul_dtype=matmul_dtype)
    s_stack = precomputed["s_stack"]
    row_start = precomputed["row_start"]
    emb = precomputed["emb"]
    emb_rep = precomputed["emb_rep"]
    wpa = precomputed["wpa"]
    Ns = s_stack.shape[1]
    cout_pad = wpa.shape[1]

    x_f32 = x.astype(jnp.float32)

    kernel = functools.partial(
        _hhavwgcn_kernel, cheb_k=K, node_num=node_num, row_start=row_start,
        dim_in=Cin, embed_dim=D, matmul_dtype=matmul_dtype)

    grid_spec = pltpu.PrefetchScalarGridSpec(
        num_scalar_prefetch=0,
        grid=(B,),
        in_specs=[
            # constant blocks: DMA'd once, resident across the batch grid axis
            pl.BlockSpec(((K - 1) * node_num, Ns), lambda b: (0, 0)),
            pl.BlockSpec((1, Ns, Cin), lambda b: (b, 0, 0)),
            pl.BlockSpec((node_num, D * K * Cin), lambda b: (0, 0)),
            pl.BlockSpec((node_num, D), lambda b: (0, 0)),
            pl.BlockSpec((D * K * Cin + D, cout_pad), lambda b: (0, 0)),
        ],
        out_specs=pl.BlockSpec((1, node_num, cout_pad), lambda b: (b, 0, 0)),
    )

    operands = (s_stack, x_f32, emb_rep, emb, wpa)
    flops = 2 * B * ((K - 1) * node_num * Ns * Cin
                     + node_num * (D * K * Cin + D) * cout_pad)
    bytes_accessed = int(sum(int(a.size) * a.dtype.itemsize for a in operands)
                         + B * node_num * cout_pad * 4)

    out_pad = pl.pallas_call(
        kernel,
        out_shape=jax.ShapeDtypeStruct((B, node_num, cout_pad), jnp.float32),
        grid_spec=grid_spec,
        compiler_params=pltpu.CompilerParams(
            dimension_semantics=("parallel",)),
        cost_estimate=pl.CostEstimate(flops=flops, transcendentals=0,
                                      bytes_accessed=bytes_accessed),
    )(*operands)

    return out_pad[:, :, :Cout]                # drop the lane padding


# ----------------------------------------------------------------------------
# Pure-JAX reference mirroring the PyTorch forward exactly.
# ----------------------------------------------------------------------------
def hhavwgcn_ref(x, node_embeddings, adj, weights_pool, bias_pool, cheb_k):
    node_num = adj.shape[0]
    if x.shape[1] == node_num:
        supports = adj.astype(jnp.float32)
    else:
        supports = construct_adj(adj, 3)
    Ns = supports.shape[0]
    support_set = [jnp.eye(Ns, dtype=jnp.float32), supports]
    for _ in range(2, cheb_k):
        support_set.append(2 * supports @ support_set[-1] - support_set[-2])
    supports_s = jnp.stack(support_set, axis=0)
    weights = jnp.einsum('nd,dkio->nkio', node_embeddings, weights_pool)
    bias = node_embeddings @ bias_pool
    x_g = jnp.einsum('knm,bmc->bknc', supports_s, x)
    x_g = jnp.transpose(x_g, (0, 2, 1, 3))
    if x_g.shape[1] == 3 * node_num:
        x_g = x_g.reshape(x_g.shape[0], 3, node_num,
                          x_g.shape[2], x_g.shape[3])[:, 1]
    return jnp.einsum('bnki,nkio->bno', x_g, weights) + bias


if __name__ == "__main__":
    key = jax.random.PRNGKey(0)
    B, node_num, dim_in, dim_out, embed_dim, cheb_k = 2, 16, 4, 32, 8, 3
    k1, k2, k3, k4, k5, k6 = jax.random.split(key, 6)

    x = jax.random.normal(k1, (B, node_num, dim_in), jnp.float32)
    node_embeddings = jax.random.normal(k2, (node_num, embed_dim), jnp.float32)
    adj = jax.random.uniform(k3, (node_num, node_num), jnp.float32)
    adj = 0.5 * (adj + adj.T)
    weights_pool = 0.1 * jax.random.normal(
        k4, (embed_dim, cheb_k, dim_in, dim_out), jnp.float32)
    bias_pool = 0.1 * jax.random.normal(k5, (embed_dim, dim_out), jnp.float32)

    # ---- branch 1: x has node_num nodes (strict f32 MXU path) ----
    out = hhavwgcn_forward(x, node_embeddings, adj, weights_pool, bias_pool,
                           cheb_k, matmul_dtype=jnp.float32)
    jax.block_until_ready(out)
    ref = hhavwgcn_ref(x, node_embeddings, adj, weights_pool, bias_pool, cheb_k)
    assert out.shape == (B, node_num, dim_out)
    assert jnp.allclose(out, ref, atol=1e-3, rtol=1e-3)

    # ---- branch 2: x has 3*node_num nodes (local spatio-temporal graph) ----
    # Precompute the static operands ONCE per graph/model and reuse them.
    x3 = jax.random.normal(k6, (B, 3 * node_num, dim_in), jnp.float32)
    pre_f32 = hhavwgcn_precompute(node_embeddings, adj, weights_pool, bias_pool,
                                  cheb_k, 3 * node_num,
                                  matmul_dtype=jnp.float32)
    out3 = hhavwgcn_forward(x3, node_embeddings, adj, weights_pool, bias_pool,
                            cheb_k, matmul_dtype=jnp.float32,
                            precomputed=pre_f32)
    jax.block_until_ready(out3)
    ref3 = hhavwgcn_ref(x3, node_embeddings, adj, weights_pool, bias_pool,
                        cheb_k)
    assert out3.shape == (B, node_num, dim_out)
    assert jnp.allclose(out3, ref3, atol=1e-3, rtol=1e-3)

    # ---- default path: bf16 MXU operands, f32 accumulation & f32 recursion ----
    pre_bf16 = hhavwgcn_precompute(node_embeddings, adj, weights_pool,
                                   bias_pool, cheb_k, 3 * node_num,
                                   matmul_dtype=jnp.bfloat16)
    out3_bf16 = hhavwgcn_forward(x3, node_embeddings, adj, weights_pool,
                                 bias_pool, cheb_k, precomputed=pre_bf16)
    jax.block_until_ready(out3_bf16)
    rel = jnp.linalg.norm(out3_bf16 - ref3) / jnp.linalg.norm(ref3)
    assert rel < 3e-2

    print("KERNEL_OK")
</pallas_src>

<mosaic_0001>
module attributes {stable_mosaic.version = 11 : i64} {
  func.func @_hhavwgcn_kernel(%arg0: i32, %arg1: memref<32x16xf32, #tpu.memory_space<vmem>>, %arg2: memref<1x16x4xf32, #tpu.memory_space<vmem>>, %arg3: memref<16x96xf32, #tpu.memory_space<vmem>>, %arg4: memref<16x8xf32, #tpu.memory_space<vmem>>, %arg5: memref<104x128xf32, #tpu.memory_space<vmem>>, %arg6: memref<1x16x128xf32, #tpu.memory_space<vmem>>) attributes {dimension_semantics = [#tpu.dimension_semantics<parallel>], iteration_bounds = array<i64: 2>, scalar_prefetch = 0 : i64, scratch_operands = 0 : i64, tpu.core_type = #tpu.core_type<tc>, window_params = [{pipeline_mode = #tpu.pipeline_mode<synchronous>, transform_indices = @transform_0, window_bounds = array<i64: 32, 16>}, {transform_indices = @transform_1, window_bounds = array<i64: 1, 16, 4>}, {pipeline_mode = #tpu.pipeline_mode<synchronous>, transform_indices = @transform_2, window_bounds = array<i64: 16, 96>}, {pipeline_mode = #tpu.pipeline_mode<synchronous>, transform_indices = @transform_3, window_bounds = array<i64: 16, 8>}, {pipeline_mode = #tpu.pipeline_mode<synchronous>, transform_indices = @transform_4, window_bounds = array<i64: 104, 128>}, {transform_indices = @transform_5, window_bounds = array<i64: 1, 16, 128>}]} {
    %c0 = arith.constant 0 : index
    %c0_0 = arith.constant 0 : index
    %c0_1 = arith.constant 0 : index
    %0 = vector.load %arg2[%c0, %c0_0, %c0_1] : memref<1x16x4xf32, #tpu.memory_space<vmem>>, vector<1x16x4xf32>
    %1 = vector.shape_cast %0 : vector<1x16x4xf32> to vector<16x4xf32>
    %c0_2 = arith.constant 0 : index
    %c0_3 = arith.constant 0 : index
    %2 = vector.load %arg1[%c0_2, %c0_3] : memref<32x16xf32, #tpu.memory_space<vmem>>, vector<32x16xf32>
    %cst = arith.constant dense<0.000000e+00> : vector<32x4xf32>
    %3 = tpu.matmul %2, %1, %cst {dimension_numbers = #tpu.dot_dimension_numbers<[1], [0], [0], [1], [0, 0, 1, 1], [], []>} : vector<32x16xf32>, vector<16x4xf32>, vector<32x4xf32> -> vector<32x4xf32>
    %4 = vector.extract_strided_slice %3 {offsets = [0, 0], sizes = [16, 4], strides = [1, 1]} : vector<32x4xf32> to vector<16x4xf32>
    %5 = vector.extract_strided_slice %3 {offsets = [16, 0], sizes = [16, 4], strides = [1, 1]} : vector<32x4xf32> to vector<16x4xf32>
    %6 = tpu.concatenate %1, %4, %5 in 1 : vector<16x4xf32>, vector<16x4xf32>, vector<16x4xf32> -> vector<16x12xf32>
    %7 = tpu.concatenate %6, %6, %6, %6, %6, %6, %6, %6 in 1 : vector<16x12xf32>, vector<16x12xf32>, vector<16x12xf32>, vector<16x12xf32>, vector<16x12xf32>, vector<16x12xf32>, vector<16x12xf32>, vector<16x12xf32> -> vector<16x96xf32>
    %c0_4 = arith.constant 0 : index
    %c0_5 = arith.constant 0 : index
    %8 = vector.load %arg3[%c0_4, %c0_5] : memref<16x96xf32, #tpu.memory_space<vmem>>, vector<16x96xf32>
    %9 = arith.mulf %8, %7 : vector<16x96xf32>
    %c0_6 = arith.constant 0 : index
    %c0_7 = arith.constant 0 : index
    %10 = vector.load %arg4[%c0_6, %c0_7] : memref<16x8xf32, #tpu.memory_space<vmem>>, vector<16x8xf32>
    %11 = tpu.concatenate %9, %10 in 1 : vector<16x96xf32>, vector<16x8xf32> -> vector<16x104xf32>
    %c0_8 = arith.constant 0 : index
    %c0_9 = arith.constant 0 : index
    %12 = vector.load %arg5[%c0_8, %c0_9] : memref<104x128xf32, #tpu.memory_space<vmem>>, vector<104x128xf32>
    %cst_10 = arith.constant dense<0.000000e+00> : vector<16x128xf32>
    %13 = tpu.matmul %11, %12, %cst_10 {dimension_numbers = #tpu.dot_dimension_numbers<[1], [0], [0], [1], [0, 0, 1, 1], [], []>} : vector<16x104xf32>, vector<104x128xf32>, vector<16x128xf32> -> vector<16x128xf32>
    %c0_11 = arith.constant 0 : index
    %c0_12 = arith.constant 0 : index
    %c0_13 = arith.constant 0 : index
    %14 = vector.load %arg6[%c0_11, %c0_12, %c0_13] : memref<1x16x128xf32, #tpu.memory_space<vmem>>, vector<1x16x128xf32>
    %15 = vector.shape_cast %14 : vector<1x16x128xf32> to vector<16x128xf32>
    %16 = vector.shape_cast %13 : vector<16x128xf32> to vector<1x16x128xf32>
    tpu.vector_store %arg6[%c0_11, %c0_12, %c0_13], %16 {strides = array<i32>} : memref<1x16x128xf32, #tpu.memory_space<vmem>>, vector<1x16x128xf32>,
    return
  }
  func.func @transform_0(%arg0: i32) -> (i32, i32) {
    %c0_i32 = arith.constant 0 : i32
    %c0_i32_0 = arith.constant 0 : i32
    %c0_i32_1 = arith.constant 0 : i32
    return %c0_i32, %c0_i32_0 : i32, i32
  }
  func.func @transform_1(%arg0: i32) -> (i32, i32, i32) {
    %c0_i32 = arith.constant 0 : i32
    %c0_i32_0 = arith.constant 0 : i32
    %c0_i32_1 = arith.constant 0 : i32
    return %arg0, %c0_i32, %c0_i32_0 : i32, i32, i32
  }
  func.func @transform_2(%arg0: i32) -> (i32, i32) {
    %c0_i32 = arith.constant 0 : i32
    %c0_i32_0 = arith.constant 0 : i32
    %c0_i32_1 = arith.constant 0 : i32
    return %c0_i32, %c0_i32_0 : i32, i32
  }
  func.func @transform_3(%arg0: i32) -> (i32, i32) {
    %c0_i32 = arith.constant 0 : i32
    %c0_i32_0 = arith.constant 0 : i32
    %c0_i32_1 = arith.constant 0 : i32
    return %c0_i32, %c0_i32_0 : i32, i32
  }
  func.func @transform_4(%arg0: i32) -> (i32, i32) {
    %c0_i32 = arith.constant 0 : i32
    %c0_i32_0 = arith.constant 0 : i32
    %c0_i32_1 = arith.constant 0 : i32
    return %c0_i32, %c0_i32_0 : i32, i32
  }
  func.func @transform_5(%arg0: i32) -> (i32, i32, i32) {
    %c0_i32 = arith.constant 0 : i32
    %c0_i32_0 = arith.constant 0 : i32
    %c0_i32_1 = arith.constant 0 : i32
    return %arg0, %c0_i32, %c0_i32_0 : i32, i32, i32
  }
}

</mosaic_0001>

<bundles_post_ra>
// kernel: tpu_custom_call.1
= control target key start
LH: loop header
LB: loop body
LE: loop exit
PB: predicated region body
PF: predicated region fallthrough
CT: control target
= control target key end

     0   :  { %10 = vsyncpa [#allocation3], 0  ;;  %s960_s0 = inlined_call_operand.vmem [shape: f32[32,16], index: 0, kind: input, shape index: {}]   ;;  %s961_s1 = inlined_call_operand.vmem [shape: f32[2,16,4], index: 1, kind: input, shape index: {}]   ;;  %s962_s2 = inlined_call_operand.hbm [shape: f32[16,96], index: 2, kind: input, shape index: {}]   ;;  %s963_s3 = inlined_call_operand.vmem [shape: f32[16,8], index: 3, kind: input, shape index: {}]   ;;  %s964_s4 = inlined_call_operand.vmem [shape: f32[104,128], index: 4, kind: input, shape index: {}]   ;;  %s965_s5 = inlined_call_operand.hbm [shape: f32[2,16,128], index: 5, kind: output, shape index: {}]  }
   0x1   :  { %11 = vsyncpa [#allocation4], 0 }
   0x2   :  { %13 = vsyncpa [#allocation4 + $0x1], 0  ;;  %s769_s18 = smov 0   ;;  %s771_s19 = smov 0  }
   0x3   :  { %s773_s20 = smov 0   ;;  %s775_s21 = smov 0  }
   0x4 LB: > { %s790_s22 = sadd.s32 4294967295, %s723_s21   ;;  %s527_s23 = sadd.s32 4294967294, %s723_s21   ;;  %s723_s21 = sphi %s775_s21, %s971_s21   ;;  %s719_s20 = sphi %s773_s20, %s970_s20   ;;  %s715_s19 = sphi %s771_s19, %s969_s19   ;;  %s711_s18 = sphi %s769_s18, %s968_s18  }
   0x5   : > { %s794_s24 = sadd.s32 1, %s723_s21   ;;  %s136_s25 = sadd.s32 1, %s719_s20 }
   0x6   : > { %s133_s26 = ssub.s32 %s723_s21, %s794_s24  ;;  %p146_p0 = scmp.ne.s32.totalorder %s719_s20, %s715_s19 }
   0x7   : > { %p134_p1 = scmp.eq.s32.totalorder %s133_s26, 0  ;;  %p147_p2 = scmp.eq.s32.totalorder %s790_s22, 1 }
   0x8   : > { %p152_p3 = scmp.ne.s32.totalorder %s715_s19, %s711_s18  ;;  %p153_p4 = scmp.eq.s32.totalorder %s527_s23, 1 }
   0x9   : > { %s805_s27 = scalar_select %p134_p1, %s719_s20, %s136_s25  }
   0xa   : > { %p807_p5 = por %p147_p2, %p146_p0  ;;  %p811_p6 = por %p153_p4, %p152_p3 }
   0xb   : > { %p528_p7 = scmp.ge.s32.totalorder %s723_s21, 1  ;;  %p160_p8 = scmp.lt.s32.totalorder %s723_s21, 3 }
   0xc   : > { %p578_p9 = scmp.eq.s32.totalorder %s790_s22, 0  ;;  %s174_s7 = sshll.u32 %s962_s2, 4  ;;  %s175_s7 = int_to_ptr.hbm [resolvable:$true] %s174_s7 }
   0xd   : > { %p161_p10 = pnand %p528_p7, %p160_p8  ;;  %s725_s8 = smov [#allocation2]  }
   0xe   : > { %s176_s9 = sshll.u32 %s725_s8, 4  ;;  %s726_s10 = smov 128   ;;  %s177_s9 = int_to_ptr.vmem [resolvable:$true] %s176_s9 }
   0xf   : > { %p570_p11 = pneg %p161_p10  ;;  %s727_s11 = smov 8  }
  0x10   : > { %206 = sbr.rel (%p161_p10) target bundleno = 567 (0x237), region = 40 }
  0x11   : > { %p571_p12 = pnand %p578_p9, %p570_p11 }
  0x13   : > { %573 = dma.hbm_to_vmem [thread:$0]  (!%p571_p12), %s175_s7, 256, %s177_s9, [#allocation3], %s726_s10, %s726_s10, %s727_s11  }
  0x15   : > { %702 = dma.done.wait (%p578_p9), [#allocation3], 256  }
  0x16   : > { %704 = vsyncadd (%p578_p9), [#allocation3], 4294967040  ;;  %p235_p13 = scmp.lt.s32.totalorder %s790_s22, 1  ;;  %v243_v2 = vld [vmem:[%s960_s0 + $0x8] sm:$0xff]  ;;  %vm246_vm0 = vcmask 130048   ;;  %v242_v3 = vld [vmem:[%s960_s0] sm:$0xff] }
  0x17   : > { %v244_v4 = vld [vmem:[%s960_s0 + $0x10] sm:$0xff]  ;;  %v245_v5 = vld [vmem:[%s960_s0 + $0x18] sm:$0xff]  ;;  %s728_s9 = smov 4   ;;  %s729_s10 = smov 8   ;;  %v380_v10 = vld [vmem:[%s963_s3 + $0x8] sm:$0xff]  ;;  %vm304_vm1 = vcmask 31744  }
  0x18   : > { %s236_s12 = scalar_select %p235_p13, %s790_s22, 1  ;;  %vm307_vm2 = vcmask 64512   ;;  %v379_v19 = vld [vmem:[%s963_s3] sm:$0xff]  ;;  %v403_v21 = vld [vmem:[%s964_s4 + $0x58] sm:$0xff]  ;;  %v402_v22 = vld [vmem:[%s964_s4 + $0x50] sm:$0xff]  ;;  %vm354_vm3 = vcmask 97280  }
  0x19   : > { %s731_s14 = smov 48   ;;  %s732_s15 = smov 24   ;;  %v404_v20 = vld [vmem:[%s964_s4 + $0x60] sm:$0xff]  ;;  %v401_v23 = vld [vmem:[%s964_s4 + $0x48] sm:$0xff]  ;;  %v399_v26 = vld [vmem:[%s964_s4 + $0x38] sm:$0xff]  ;;  %vm357_vm4 = vcmask 195584  }
  0x1a   : > { %s547_s13 = sshll.u32 %s236_s12, 4  ;;  %s734_s17 = smov 36   ;;  %551 = vmatpush.msra.mxu2 %v404_v20  ;;  %415 = vmatpush.msra.mxu1 %v404_v20  ;;  %v400_v24 = vld [vmem:[%s964_s4 + $0x40] sm:$0xff]  ;;  %v398_v27 = vld [vmem:[%s964_s4 + $0x30] sm:$0xff]  ;;  %v397_v28 = vld [vmem:[%s964_s4 + $0x28] sm:$0xff]  ;;  %vm360_vm5 = vcmask 293888  }
  0x1b   : > { %s239_s16 = scalar_lea.vmem %s961_s1, %s547_s13  ;;  %s730_s13 = smov 96   ;;  %v396_v29 = vld [vmem:[%s964_s4 + $0x20] sm:$0xff]  ;;  %v395_v30 = vld [vmem:[%s964_s4 + $0x18] sm:$0xff]  ;;  %v394_v32 = vld [vmem:[%s964_s4 + $0x10] sm:$0xff]  ;;  %vm366_vm6 = vcmask 490496   ;;  %vm363_vm7 = vcmask 392192  }
  0x1c   : > { %v241_v0 = vld [vmem:[%s239_s16 + $0x8] sm:$0xff]  ;;  %v240_v1 = vld [vmem:[%s239_s16] sm:$0xff]  ;;  %s733_s16 = smov 12   ;;  %s735_s23 = smov 72   ;;  %552 = vmatpush.msra.mxu2 %v403_v21  ;;  %416 = vmatpush.msra.mxu1 %v403_v21  ;;  %vm369_vm8 = vcmask 588800   ;;  %vm372_vm9 = vcmask 687104  }
  0x1d   : > { %549 = vmatpush.msra.mxu3 %v241_v0  ;;  %273 = vmatpush.msra.mxu0 %v241_v0  ;;  %s736_s25 = smov 60   ;;  %s737_s26 = smov 84   ;;  %v393_v33 = vld [vmem:[%s964_s4 + $0x8] sm:$0xff]  ;;  %v392_v34 = vld [vmem:[%s964_s4] sm:$0xff]  ;;  %vm389_vm10 = vcmask 785408   ;;  %vm405_vm11 = vcmask 850944  }
  0x1e   : > { %553 = vmatpush.msra.mxu2 %v402_v22  ;;  %417 = vmatpush.msra.mxu1 %v402_v22  ;;  %v376_v51 = vld [vmem:[#allocation2 + $0x8] sm:$0xff] }
  0x1f   : > { %550 = vmatpush.msra.mxu3 %v240_v1  ;;  %274 = vmatpush.msra.mxu0 %v240_v1 }
  0x20   : > { %537 = vmatmul.msk.f32.vlgmr.msra.gmra.mxu3 %vm246_vm0, %v243_v2  ;;  %536 = vmatmul.msk.f32.vlgmr.msra.gmra.mxu0 %vm246_vm0, %v242_v3 }
  0x21   : > { %554 = vmatpush.msra.mxu2 %v401_v23  ;;  %418 = vmatpush.msra.mxu1 %v401_v23 }
  0x23   : > { %555 = vmatpush.msra.mxu2 %v400_v24  ;;  %419 = vmatpush.msra.mxu1 %v400_v24 }
  0x25   : > { %556 = vmatpush.msra.mxu2 %v399_v26  ;;  %420 = vmatpush.msra.mxu1 %v399_v26 }
  0x27   : > { %557 = vmatpush.msra.mxu2 %v398_v27  ;;  %421 = vmatpush.msra.mxu1 %v398_v27 }
  0x28   : > { %538 = vmatmul.msk.f32.gmra.mxu3 %vm246_vm0, %v244_v4 }
  0x29   : > { %558 = vmatpush.msra.mxu2 %v397_v28  ;;  %422 = vmatpush.msra.mxu1 %v397_v28 }
  0x2b   : > { %559 = vmatpush.msra.mxu2 %v396_v29  ;;  %423 = vmatpush.msra.mxu1 %v396_v29 }
  0x2d   : > { %560 = vmatpush.msra.mxu2 %v395_v30  ;;  %424 = vmatpush.msra.mxu1 %v395_v30 }
  0x2f   : > { %561 = vmatpush.msra.mxu2 %v394_v32  ;;  %425 = vmatpush.msra.mxu1 %v394_v32 }
  0x30   : > { %539 = vmatmul.msk.f32.gmra.mxu3 %vm246_vm0, %v245_v5 }
  0x31   : > { %562 = vmatpush.msra.mxu2 %v393_v33  ;;  %426 = vmatpush.msra.mxu1 %v393_v33 }
  0x33   : > { %563 = vmatpush.msra.mxu2 %v392_v34  ;;  %427 = vmatpush.msra.mxu1 %v392_v34 }
  0x9d   : > { %v276_v6 = vpop.f32.mrf.mxu0 }
  0x9e   : > { %290 = vrot.lane.b32.xlu1 %v276_v6, %s728_s9 }
  0xa3   : > { %v279_v7 = vpop.f32.mrf.mxu3 }
  0xa4   : > { %292 = vrot.lane.b32.xlu0 %v279_v7, %s728_s9 }
  0xab   : > { %v282_v8 = vpop.f32.mrf.mxu3 }
  0xac   : > { %298 = vrot.lane.b32.xlu1 %v282_v8, %s729_s10 }
  0xb3   : > { %v285_v9 = vpop.f32.mrf.mxu3 }
  0xb4   : > { %300 = vrot.lane.b32.xlu0 %v285_v9, %s729_s10 }
  0xbc   : > { %385 = vrot.lane.b32.xlu0 %v380_v10, %s730_s13 }
 0x110   : > { %v291_v11 = vpop.permute.xlu1 %290 }
 0x111   : > { %v305_v13 = vsel %vm304_vm1, %v240_v1, %v291_v11  ;;  %v375_v1 = vld [vmem:[#allocation2] sm:$0xff] }
 0x116   : > { %v293_v12 = vpop.permute.xlu0 %292 }
 0x117   : > { %v306_v16 = vsel %vm304_vm1, %v241_v0, %v293_v12 }
 0x11e   : > { %v299_v14 = vpop.permute.xlu1 %298 }
 0x11f   : > { %v850_v15 = vsel %vm307_vm2, %v305_v13, %v299_v14 }
 0x120   : > { %330 = vrot.lane.b32.xlu2 %v850_v15, %s731_s14  ;;  %318 = vrot.lane.b32.xlu0 %v850_v15, %s732_s15 }
 0x121   : > { %312 = vrot.lane.b32.xlu1 %v850_v15, %s733_s16 }
 0x126   : > { %v301_v17 = vpop.permute.xlu0 %300 }
 0x127   : > { %v855_v18 = vsel %vm307_vm2, %v306_v16, %v301_v17 }
 0x128   : > { %314 = vrot.lane.b32.xlu2 %v855_v18, %s733_s16  ;;  %326 = vrot.lane.b32.xlu0 %v855_v18, %s734_s17 }
 0x129   : > { %324 = vrot.lane.b32.xlu1 %v850_v15, %s734_s17  ;;  %s677_s17 = scalar_lea.hbm %s965_s5, 32 }
 0x12e   : > { %v386_v35 = vpop.permute.xlu0 %385 }
 0x130   : > { %320 = vrot.lane.b32.xlu2 %v855_v18, %s732_s15  ;;  %344 = vrot.lane.b32.xlu0 %v855_v18, %s735_s23 }
 0x131   : > { %332 = vrot.lane.b32.xlu1 %v855_v18, %s731_s14 }
 0x138   : > { %338 = vrot.lane.b32.xlu2 %v855_v18, %s736_s25  ;;  %348 = vrot.lane.b32.xlu0 %v850_v15, %s737_s26 }
 0x139   : > { %336 = vrot.lane.b32.xlu1 %v850_v15, %s736_s25  ;;  %s232_s25 = sand.u32 1, %s715_s19  }
 0x13a   : > { %s533_s30 = sshll.u32 %s232_s25, 4  ;;  %s438_s14 = scalar_lea.sflag [#allocation4], %s232_s25 }
 0x13b   : > { %s234_s9 = scalar_lea.vmem [#allocation5], %s533_s30 }
 0x13c   : > { %s450_s11 = sshll.u32 %s234_s9, 4  ;;  %s451_s11 = int_to_ptr.vmem [resolvable:$true] %s450_s11 }
 0x140   : > { %350 = vrot.lane.b32.xlu2 %v855_v18, %s737_s26  ;;  %s548_s26 = sshll.u32 %s790_s22, 4 }
 0x141   : > { %383 = vrot.lane.b32.xlu1 %v379_v19, %s730_s13  ;;  %s449_s8 = scalar_lea.hbm %s965_s5, %s548_s26 }
 0x142   : > { %s452_s12 = sshll.u32 %s449_s8, 4  ;;  %s453_s12 = int_to_ptr.hbm [resolvable:$true] %s452_s12 }
 0x143   : > { %s671_s15 = sshra.s32 %s453_s12, 4  ;;  %s672_s15 = int_to_ptr.hbm [resolvable:$true] %s671_s15 }
 0x144   : > { %s673_s13 = scalar_lea.hbm %s672_s15, 16  ;;  %p678_p3 = scmp.lt.s32.totalorder %s672_s15, %s965_s5 }
 0x145   : > { %p674_p0 = scmp.ne.s32.totalorder %s672_s15, %s673_s13  ;;  %p679_p4 = scmp.lt.s32.totalorder %s677_s17, %s673_s13 }
 0x147   : > { %p675_p1 = pnand %p674_p0, %p807_p5  ;;  %p680_p7 = por %p679_p4, %p678_p3 }
 0x148   : > { %342 = vrot.lane.b32.xlu2 %v850_v15, %s735_s23 }
 0x149   : > { %p676_p2 = pneg %p675_p1 }
 0x14b   : > { %p681_p8 = pnand %p680_p7, %p676_p2 }
 0x17a   : > { %v331_v25 = vpop.permute.xlu2 %330 }
 0x182   : > { %v315_v31 = vpop.permute.xlu2 %314 }
 0x183   : > { %v356_v42 = vsel %vm354_vm3, %v855_v18, %v315_v31 }
 0x18a   : > { %v321_v36 = vpop.permute.xlu2 %320 }
 0x18b   : > { %v359_v43 = vsel %vm357_vm4, %v356_v42, %v321_v36 }
 0x192   : > { %v319_v37 = vpop.permute.xlu0 %318  ;;  %v339_v39 = vpop.permute.xlu2 %338 }
 0x193   : > { %v313_v38 = vpop.permute.xlu1 %312 }
 0x194   : > { %v355_v47 = vsel %vm354_vm3, %v850_v15, %v313_v38 }
 0x195   : > { %v358_v53 = vsel %vm357_vm4, %v355_v47, %v319_v37 }
 0x19a   : > { %v327_v40 = vpop.permute.xlu0 %326  ;;  %v351_v44 = vpop.permute.xlu2 %350 }
 0x19b   : > { %v325_v41 = vpop.permute.xlu1 %324  ;;  %v362_v45 = vsel %vm360_vm5, %v359_v43, %v327_v40 }
 0x19c   : > { %v361_v55 = vsel %vm360_vm5, %v358_v53, %v325_v41 }
 0x19d   : > { %v364_v58 = vsel %vm363_vm7, %v361_v55, %v331_v25 }
 0x1a2   : > { %v345_v48 = vpop.permute.xlu0 %344  ;;  %v343_v60 = vpop.permute.xlu2 %342 }
 0x1a3   : > { %v333_v46 = vpop.permute.xlu1 %332 }
 0x1a4   : > { %v365_v49 = vsel %vm363_vm7, %v362_v45, %v333_v46 }
 0x1a5   : > { %v368_v50 = vsel %vm366_vm6, %v365_v49, %v339_v39 }
 0x1a6   : > { %v371_v52 = vsel %vm369_vm8, %v368_v50, %v345_v48 }
 0x1a7   : > { %v374_v54 = vsel %vm372_vm9, %v371_v52, %v351_v44 }
 0x1a8   : > { %v378_v56 = vmul.f32 %v376_v51, %v374_v54 }
 0x1aa   : > { %v391_v57 = vsel %vm389_vm10, %v378_v56, %v386_v35  ;;  %v349_v63 = vpop.permute.xlu0 %348 }
 0x1ab   : > { %541 = vmatmul.msk.f32.vlgmr.msra.gmra.mxu2 %vm405_vm11, %v391_v57  ;;  %v337_v59 = vpop.permute.xlu1 %336 }
 0x1ac   : > { %v367_v61 = vsel %vm366_vm6, %v364_v58, %v337_v59 }
 0x1ad   : > { %v370_v62 = vsel %vm369_vm8, %v367_v61, %v343_v60 }
 0x1ae   : > { %v373_v0 = vsel %vm372_vm9, %v370_v62, %v349_v63 }
 0x1af   : > { %v377_v2 = vmul.f32 %v375_v1, %v373_v0 }
 0x1b3   : > { %v384_v3 = vpop.permute.xlu1 %383 }
 0x1b4   : > { %v390_v4 = vsel %vm389_vm10, %v377_v2, %v384_v3 }
 0x1b5   : > { %540 = vmatmul.msk.f32.vlgmr.msra.gmra.mxu1 %vm405_vm11, %v390_v4 }
 0x22e   : > { %v432_v5 = vpop.f32.mrf.mxu2 }
 0x22f   : > { %436 = vst [vmem:[%s234_s9 + $0x8] sm:$0xff] %v432_v5 }
 0x232   : > { %v429_v6 = vpop.f32.mrf.mxu1 }
 0x233   : > { %435 = vst [vmem:[%s234_s9] sm:$0xff] %v429_v6 }
 0x234   : > { %684 = shalt.err (!%p681_p8)
}
 0x235   : > { %s738_s25 = smov 128  }
 0x236   : > { %568 = dma.vmem_to_hbm [thread:$0]  (%p807_p5), %s451_s11, 256, %s453_s12, %s438_s14, %s738_s25, %s738_s25, %s729_s10  }
 0x237 PF: > { %p580_p9 = scmp.ge.s32.totalorder %s723_s21, 2  ;;  %s467_s30 = sand.u32 1, %s711_s18  }
 0x238   : > { %s468_s6 = scalar_lea.sflag [#allocation4], %s467_s30 }
 0x239   : > { %p575_p10 = pnand %p580_p9, %p811_p6 }
 0x23b   : > { %p576_p11 = pneg %p575_p10 }
 0x23d   : > { %706 = dma.done.wait (%p576_p11), %s468_s6, 256  }
 0x23e   : > { %708 = vsyncadd (%p576_p11), %s468_s6, 4294967040  ;;  %p16_p12 = scmp.ge.s32.totalorder %s794_s24, 4   ;;  %s968_s18 = smov %s715_s19 }
 0x23f   : > { %s969_s19 = smov %s719_s20  ;;  %s970_s20 = smov %s805_s27 }
 0x240   : > { %s971_s21 = smov %s794_s24  ;;  %18 = sbr.rel (!%p16_p12) target bundleno = 4 (0x4), region = 80 }
 0x245   :  { %474 = vsyncpa [#allocation3], 1 }
 0x246   :  { %476 = vsyncpa [#allocation3 + $0x1], 1 }
 0x247   :  { %477 = vsyncpa [#allocation4], 1 }
 0x248   :  { %479 = vsyncpa [#allocation4 + $0x1], 1 }

</bundles_post_ra>
